<compile_context>
chip_gen: v6e
topology: v6e:2x2x1
jax: 0.10.0
libtpu: 0.0.40
codegen_flags: <defaults>
</compile_context>

<pallas_src>
import jax
import jax.numpy as jnp
from jax.experimental import pallas as pl
from jax.experimental.pallas import tpu as pltpu

LANE = 128  # TPU lane width; final-layer output padded to a multiple of this.


# --------------------------------------------------------------------------- #
# Kernel
# --------------------------------------------------------------------------- #
def _mlp_kernel(x_ref, w1_ref, b1_ref, w2_ref, b2_ref, w3_ref, b3_ref, o_ref):
    # x arrives f32 straight from HBM; cast to bf16 in-kernel (hidden under MXU).
    x = x_ref[...].astype(jnp.bfloat16)
    # Layer 1: Linear(C, C) + ReLU.  bf16 MXU inputs, f32 accumulation.
    h1 = jnp.dot(x, w1_ref[...], preferred_element_type=jnp.float32)
    h1 = jnp.maximum(h1 + b1_ref[...], 0.0).astype(jnp.bfloat16)
    # Layer 2: Linear(C, C//2) + ReLU.
    h2 = jnp.dot(h1, w2_ref[...], preferred_element_type=jnp.float32)
    h2 = jnp.maximum(h2 + b2_ref[...], 0.0).astype(jnp.bfloat16)
    # Layer 3: Linear(C//2, D_pad)  (zero-padded columns sliced off outside).
    out = jnp.dot(h2, w3_ref[...], preferred_element_type=jnp.float32) + b3_ref[...]
    o_ref[...] = out.astype(o_ref.dtype)


# --------------------------------------------------------------------------- #
# One-time parameter preparation (NOT on the per-call forward path)
# --------------------------------------------------------------------------- #
def prepare_params(params):
    """Convert weights to bf16 and pad the final layer lane-dense, once.

    Doing this at parameter-creation/update time removes a full HBM read+write
    pass over every weight (and the pad scatter) from each forward call.
    Biases stay f32 (added to the f32 accumulator before ReLU).
    """
    w3, b3 = params["w3"], params["b3"]
    Ch, D = w3.shape
    D_pad = ((D + LANE - 1) // LANE) * LANE
    w3p = jnp.zeros((Ch, D_pad), jnp.bfloat16).at[:, :D].set(w3.astype(jnp.bfloat16))
    b3p = jnp.zeros((1, D_pad), jnp.float32).at[:, :D].set(b3.astype(jnp.float32))
    return {
        "w1": params["w1"].astype(jnp.bfloat16),
        "b1": params["b1"].astype(jnp.float32),
        "w2": params["w2"].astype(jnp.bfloat16),
        "b2": params["b2"].astype(jnp.float32),
        "w3": w3p,          # (Ch, D_pad) bf16, zero-padded columns
        "b3": b3p,          # (1, D_pad)  f32,  zero-padded columns
        "num_domain": D,    # python int, used only to slice the pad off
    }


# --------------------------------------------------------------------------- #
# Tiling / VMEM budget helpers
# --------------------------------------------------------------------------- #
def _pick_tile_m(B, min_steps=2):
    """Pick the batch tile.

    Caps at 256 to bound the live f32 (tile_m x C) h1 intermediate; prefers
    >= `min_steps` grid steps so v7x's two TensorCores both get work and the
    x/out pipeline has something to overlap.  Single-TC chips (v5e/v6e) can
    pass min_steps=1.
    """
    for cand in (256, 128, 64, 32, 16, 8):
        if B % cand == 0 and B // cand >= min_steps:
            return cand
    return B


def _vmem_budget_bytes(tile_m, C, Ch, D_pad):
    """Explicit VMEM budget: resident weights + buffered tiles + live h1/h2."""
    weights = (C * C + C * Ch + Ch * D_pad) * 2 + (C + Ch + D_pad) * 4  # bf16 W, f32 b (x1)
    x_tiles = 2 * tile_m * C * 4          # f32 x, double-buffered
    out_tiles = 2 * tile_m * D_pad * 4    # f32 out, double-buffered
    live = tile_m * C * (4 + 2) + tile_m * Ch * (4 + 2)  # h1/h2: f32 acc + bf16 copy
    total = int((weights + x_tiles + out_tiles + live) * 1.25)  # ~25% headroom
    total = max(total, 32 << 20)          # never below the v6e/v7x default
    return min(total, 120 << 20)          # never above physical (v5e/v6e 128 MiB)


# --------------------------------------------------------------------------- #
# Forward wrapper
# --------------------------------------------------------------------------- #
def office_discriminator_forward(x, prepared, *, tile_m=None, min_grid_steps=2):
    """x: (B, C) float32.  prepared: output of prepare_params()."""
    B, C = x.shape
    w1, b1 = prepared["w1"], prepared["b1"]
    w2, b2 = prepared["w2"], prepared["b2"]
    w3, b3 = prepared["w3"], prepared["b3"]
    D = prepared["num_domain"]
    Ch = w2.shape[1]          # channel // 2
    D_pad = w3.shape[1]       # lane-padded num_domain

    if tile_m is None:
        tile_m = _pick_tile_m(B, min_steps=min_grid_steps)
    assert B % tile_m == 0, "batch must be a multiple of the batch tile"

    # Honest cost estimate: x read as f32, weights counted once, output f32.
    flops = 2 * B * (C * C + C * Ch + Ch * D_pad)
    bytes_accessed = (
        B * C * 4                             # x (f32 in)
        + (C * C + C * Ch + Ch * D_pad) * 2   # weights (bf16)
        + (C + Ch + D_pad) * 4                # biases (f32)
        + B * D_pad * 4                       # output (f32)
    )
    cost = pl.CostEstimate(flops=flops, transcendentals=0,
                           bytes_accessed=bytes_accessed)

    grid = (B // tile_m,)
    # Grid-invariant operands -> single-buffered; x/out keep default 2 buffers.
    resident = dict(pipeline_mode=pl.Buffered(1))

    out_padded = pl.pallas_call(
        _mlp_kernel,
        out_shape=jax.ShapeDtypeStruct((B, D_pad), jnp.float32),
        grid_spec=pltpu.PrefetchScalarGridSpec(
            num_scalar_prefetch=0,
            grid=grid,
            in_specs=[
                pl.BlockSpec((tile_m, C), lambda i: (i, 0)),              # x tile (f32)
                pl.BlockSpec((C, C),      lambda i: (0, 0), **resident),  # W1 (bf16)
                pl.BlockSpec((1, C),      lambda i: (0, 0), **resident),  # b1 (f32)
                pl.BlockSpec((C, Ch),     lambda i: (0, 0), **resident),  # W2 (bf16)
                pl.BlockSpec((1, Ch),     lambda i: (0, 0), **resident),  # b2 (f32)
                pl.BlockSpec((Ch, D_pad), lambda i: (0, 0), **resident),  # W3 (bf16, padded)
                pl.BlockSpec((1, D_pad),  lambda i: (0, 0), **resident),  # b3 (f32, padded)
            ],
            out_specs=pl.BlockSpec((tile_m, D_pad), lambda i: (i, 0)),
        ),
        compiler_params=pltpu.CompilerParams(
            dimension_semantics=("parallel",),
            vmem_limit_bytes=_vmem_budget_bytes(tile_m, C, Ch, D_pad),
        ),
        cost_estimate=cost,
    )(x, w1, b1, w2, b2, w3, b3)

    return out_padded[:, :D]


# --------------------------------------------------------------------------- #
# Test harness
# --------------------------------------------------------------------------- #
def init_params(key, channel, num_domain):
    """Deterministic synthetic init matching nn.Linear shapes (weights as (in, out))."""
    k1, k2, k3, k4, k5, k6 = jax.random.split(key, 6)
    s1 = 1.0 / jnp.sqrt(channel)
    s2 = 1.0 / jnp.sqrt(channel)
    s3 = 1.0 / jnp.sqrt(channel // 2)
    return {
        "w1": jax.random.uniform(k1, (channel, channel), jnp.float32, -s1, s1),
        "b1": jax.random.uniform(k2, (1, channel), jnp.float32, -s1, s1),
        "w2": jax.random.uniform(k3, (channel, channel // 2), jnp.float32, -s2, s2),
        "b2": jax.random.uniform(k4, (1, channel // 2), jnp.float32, -s2, s2),
        "w3": jax.random.uniform(k5, (channel // 2, num_domain), jnp.float32, -s3, s3),
        "b3": jax.random.uniform(k6, (1, num_domain), jnp.float32, -s3, s3),
    }


def reference_forward(x, p):
    h1 = jnp.maximum(x @ p["w1"] + p["b1"], 0.0)
    h2 = jnp.maximum(h1 @ p["w2"] + p["b2"], 0.0)
    return h2 @ p["w3"] + p["b3"]


if __name__ == "__main__":
    # Small shapes consistent with the module: channel=256 (orig 4096), num_domain=3.
    # Batch large enough to exercise the batch-tiled grid (2 steps of 128 rows).
    BATCH, CHANNEL, NUM_DOMAIN = 256, 256, 3

    key = jax.random.PRNGKey(0)
    kx, kp = jax.random.split(key)
    x = jax.random.normal(kx, (BATCH, CHANNEL), dtype=jnp.float32)
    params = init_params(kp, CHANNEL, NUM_DOMAIN)

    # One-time weight prep (bf16 cast + lane-dense pad) happens OUTSIDE the
    # forward path; the forward only ever sees already-prepared weights.
    prepared = jax.tree_util.tree_map(jax.block_until_ready, prepare_params(params))

    out = office_discriminator_forward(x, prepared)
    out = jax.block_until_ready(out)

    ref = reference_forward(x, params)
    assert out.shape == (BATCH, NUM_DOMAIN)
    # bf16 MXU inputs with f32 accumulation vs. pure-f32 reference -> loose tol.
    assert jnp.allclose(out, ref, atol=2e-2, rtol=2e-2), "mismatch vs reference"

    print("KERNEL_OK")
</pallas_src>

<mosaic_0001>
module attributes {stable_mosaic.version = 11 : i64} {
  func.func @_mlp_kernel(%arg0: i32, %arg1: memref<128x256xf32, #tpu.memory_space<vmem>>, %arg2: memref<256x256xbf16, #tpu.memory_space<vmem>>, %arg3: memref<1x256xf32, #tpu.memory_space<vmem>>, %arg4: memref<256x128xbf16, #tpu.memory_space<vmem>>, %arg5: memref<1x128xf32, #tpu.memory_space<vmem>>, %arg6: memref<128x128xbf16, #tpu.memory_space<vmem>>, %arg7: memref<1x128xf32, #tpu.memory_space<vmem>>, %arg8: memref<128x128xf32, #tpu.memory_space<vmem>>) attributes {dimension_semantics = [#tpu.dimension_semantics<parallel>], iteration_bounds = array<i64: 2>, scalar_prefetch = 0 : i64, scratch_operands = 0 : i64, tpu.core_type = #tpu.core_type<tc>, window_params = [{transform_indices = @transform_0, window_bounds = array<i64: 128, 256>}, {pipeline_mode = #tpu.pipeline_mode<synchronous>, transform_indices = @transform_1, window_bounds = array<i64: 256, 256>}, {pipeline_mode = #tpu.pipeline_mode<synchronous>, transform_indices = @transform_2, window_bounds = array<i64: 1, 256>}, {pipeline_mode = #tpu.pipeline_mode<synchronous>, transform_indices = @transform_3, window_bounds = array<i64: 256, 128>}, {pipeline_mode = #tpu.pipeline_mode<synchronous>, transform_indices = @transform_4, window_bounds = array<i64: 1, 128>}, {pipeline_mode = #tpu.pipeline_mode<synchronous>, transform_indices = @transform_5, window_bounds = array<i64: 128, 128>}, {pipeline_mode = #tpu.pipeline_mode<synchronous>, transform_indices = @transform_6, window_bounds = array<i64: 1, 128>}, {transform_indices = @transform_7, window_bounds = array<i64: 128, 128>}]} {
    %c0 = arith.constant 0 : index
    %c0_0 = arith.constant 0 : index
    %0 = vector.load %arg1[%c0, %c0_0] : memref<128x256xf32, #tpu.memory_space<vmem>>, vector<128x256xf32>
    %1 = arith.truncf %0 : vector<128x256xf32> to vector<128x256xbf16>
    %c0_1 = arith.constant 0 : index
    %c0_2 = arith.constant 0 : index
    %2 = vector.load %arg2[%c0_1, %c0_2] : memref<256x256xbf16, #tpu.memory_space<vmem>>, vector<256x256xbf16>
    %cst = arith.constant dense<0.000000e+00> : vector<128x256xf32>
    %3 = tpu.matmul %1, %2, %cst {dimension_numbers = #tpu.dot_dimension_numbers<[1], [0], [0], [1], [0, 0, 1, 1], [], []>} : vector<128x256xbf16>, vector<256x256xbf16>, vector<128x256xf32> -> vector<128x256xf32>
    %c0_3 = arith.constant 0 : index
    %c0_4 = arith.constant 0 : index
    %4 = vector.load %arg3[%c0_3, %c0_4] : memref<1x256xf32, #tpu.memory_space<vmem>>, vector<1x256xf32>
    %5 = vector.broadcast %4 : vector<1x256xf32> to vector<128x256xf32>
    %6 = arith.addf %3, %5 : vector<128x256xf32>
    %cst_5 = arith.constant 0.000000e+00 : f32
    %7 = vector.broadcast %cst_5 : f32 to vector<128x256xf32>
    %8 = arith.maximumf %6, %7 : vector<128x256xf32>
    %9 = arith.truncf %8 : vector<128x256xf32> to vector<128x256xbf16>
    %c0_6 = arith.constant 0 : index
    %c0_7 = arith.constant 0 : index
    %10 = vector.load %arg4[%c0_6, %c0_7] : memref<256x128xbf16, #tpu.memory_space<vmem>>, vector<256x128xbf16>
    %cst_8 = arith.constant dense<0.000000e+00> : vector<128x128xf32>
    %11 = tpu.matmul %9, %10, %cst_8 {dimension_numbers = #tpu.dot_dimension_numbers<[1], [0], [0], [1], [0, 0, 1, 1], [], []>} : vector<128x256xbf16>, vector<256x128xbf16>, vector<128x128xf32> -> vector<128x128xf32>
    %c0_9 = arith.constant 0 : index
    %c0_10 = arith.constant 0 : index
    %12 = vector.load %arg5[%c0_9, %c0_10] : memref<1x128xf32, #tpu.memory_space<vmem>>, vector<1x128xf32>
    %13 = vector.broadcast %12 : vector<1x128xf32> to vector<128x128xf32>
    %14 = arith.addf %11, %13 : vector<128x128xf32>
    %cst_11 = arith.constant 0.000000e+00 : f32
    %15 = vector.broadcast %cst_11 : f32 to vector<128x128xf32>
    %16 = arith.maximumf %14, %15 : vector<128x128xf32>
    %17 = arith.truncf %16 : vector<128x128xf32> to vector<128x128xbf16>
    %c0_12 = arith.constant 0 : index
    %c0_13 = arith.constant 0 : index
    %18 = vector.load %arg6[%c0_12, %c0_13] : memref<128x128xbf16, #tpu.memory_space<vmem>>, vector<128x128xbf16>
    %cst_14 = arith.constant dense<0.000000e+00> : vector<128x128xf32>
    %19 = tpu.matmul %17, %18, %cst_14 {dimension_numbers = #tpu.dot_dimension_numbers<[1], [0], [0], [1], [0, 0, 1, 1], [], []>} : vector<128x128xbf16>, vector<128x128xbf16>, vector<128x128xf32> -> vector<128x128xf32>
    %c0_15 = arith.constant 0 : index
    %c0_16 = arith.constant 0 : index
    %20 = vector.load %arg7[%c0_15, %c0_16] : memref<1x128xf32, #tpu.memory_space<vmem>>, vector<1x128xf32>
    %21 = vector.broadcast %20 : vector<1x128xf32> to vector<128x128xf32>
    %22 = arith.addf %19, %21 : vector<128x128xf32>
    %c0_17 = arith.constant 0 : index
    %c0_18 = arith.constant 0 : index
    %23 = vector.load %arg8[%c0_17, %c0_18] : memref<128x128xf32, #tpu.memory_space<vmem>>, vector<128x128xf32>
    tpu.vector_store %arg8[%c0_17, %c0_18], %22 {strides = array<i32>} : memref<128x128xf32, #tpu.memory_space<vmem>>, vector<128x128xf32>,
    return
  }
  func.func @transform_0(%arg0: i32) -> (i32, i32) {
    %c0_i32 = arith.constant 0 : i32
    %c0_i32_0 = arith.constant 0 : i32
    return %arg0, %c0_i32 : i32, i32
  }
  func.func @transform_1(%arg0: i32) -> (i32, i32) {
    %c0_i32 = arith.constant 0 : i32
    %c0_i32_0 = arith.constant 0 : i32
    %c0_i32_1 = arith.constant 0 : i32
    return %c0_i32, %c0_i32_0 : i32, i32
  }
  func.func @transform_2(%arg0: i32) -> (i32, i32) {
    %c0_i32 = arith.constant 0 : i32
    %c0_i32_0 = arith.constant 0 : i32
    %c0_i32_1 = arith.constant 0 : i32
    return %c0_i32, %c0_i32_0 : i32, i32
  }
  func.func @transform_3(%arg0: i32) -> (i32, i32) {
    %c0_i32 = arith.constant 0 : i32
    %c0_i32_0 = arith.constant 0 : i32
    %c0_i32_1 = arith.constant 0 : i32
    return %c0_i32, %c0_i32_0 : i32, i32
  }
  func.func @transform_4(%arg0: i32) -> (i32, i32) {
    %c0_i32 = arith.constant 0 : i32
    %c0_i32_0 = arith.constant 0 : i32
    %c0_i32_1 = arith.constant 0 : i32
    return %c0_i32, %c0_i32_0 : i32, i32
  }
  func.func @transform_5(%arg0: i32) -> (i32, i32) {
    %c0_i32 = arith.constant 0 : i32
    %c0_i32_0 = arith.constant 0 : i32
    %c0_i32_1 = arith.constant 0 : i32
    return %c0_i32, %c0_i32_0 : i32, i32
  }
  func.func @transform_6(%arg0: i32) -> (i32, i32) {
    %c0_i32 = arith.constant 0 : i32
    %c0_i32_0 = arith.constant 0 : i32
    %c0_i32_1 = arith.constant 0 : i32
    return %c0_i32, %c0_i32_0 : i32, i32
  }
  func.func @transform_7(%arg0: i32) -> (i32, i32) {
    %c0_i32 = arith.constant 0 : i32
    %c0_i32_0 = arith.constant 0 : i32
    return %arg0, %c0_i32 : i32, i32
  }
}

</mosaic_0001>

<bundles_post_ra>
// kernel: tpu_custom_call.1
= control target key start
LH: loop header
LB: loop body
LE: loop exit
PB: predicated region body
PF: predicated region fallthrough
CT: control target
= control target key end

     0   :  { %s2215_s0 = inlined_call_operand.hbm [shape: f32[256,256], index: 0, kind: input, shape index: {}]   ;;  %s2216_s1 = inlined_call_operand.hbm [shape: bf16[256,256], index: 1, kind: input, shape index: {}]   ;;  %s2217_s2 = inlined_call_operand.vmem [shape: f32[1,256], index: 2, kind: input, shape index: {}]   ;;  %s2218_s3 = inlined_call_operand.hbm [shape: bf16[256,128], index: 3, kind: input, shape index: {}]   ;;  %s2219_s4 = inlined_call_operand.vmem [shape: f32[1,128], index: 4, kind: input, shape index: {}]   ;;  %s2220_s5 = inlined_call_operand.hbm [shape: bf16[128,128], index: 5, kind: input, shape index: {}]   ;;  %s2221_s6 = inlined_call_operand.vmem [shape: f32[1,128], index: 6, kind: input, shape index: {}]   ;;  %s2222_s7 = inlined_call_operand.hbm [shape: f32[256,128], index: 7, kind: output, shape index: {}]  }
   0x1   :  { %2227 = sst [smem:[#allocation15_spill]] %s2216_s1 }
   0x2   :  { %12 = vsyncpa [#allocation3], 0 }
   0x3   :  { %14 = vsyncpa [#allocation3 + $0x1], 0 }
   0x4   :  { %15 = vsyncpa [#allocation6], 0 }
   0x5   :  { %16 = vsyncpa [#allocation9], 0 }
   0x6   :  { %17 = vsyncpa [#allocation4], 0 }
   0x7   :  { %19 = vsyncpa [#allocation4 + $0x1], 0  ;;  %s1898_s24 = smov 0   ;;  %s1900_s25 = smov 0  }
   0x8   :  { %s1902_s26 = smov 0   ;;  %s1904_s27 = smov 0  }
   0x9 LB: > { %s1919_s28 = sadd.s32 4294967295, %s1843_s27   ;;  %s1314_s29 = sadd.s32 4294967294, %s1843_s27   ;;  %s1843_s27 = sphi %s1904_s27, %s2248_s27   ;;  %s1839_s26 = sphi %s1902_s26, %s2247_s26   ;;  %s1835_s25 = sphi %s1900_s25, %s2246_s25   ;;  %s1831_s24 = sphi %s1898_s24, %s2245_s24  }
   0xa   : > { %p45_p0 = scmp.ne.s32.totalorder %s1835_s25, %s1831_s24  ;;  %p2223_p1 = scmp.eq.s32.totalorder %s1919_s28, 0 }
   0xb   : > { %p201_p3 = scmp.eq.s32.totalorder %s1314_s29, 1  ;;  %p1315_p5 = scmp.ge.s32.totalorder %s1843_s27, 1 }
   0xc   : > { %p1928_p4 = por %p2223_p1, %p45_p0  ;;  %p208_p7 = scmp.lt.s32.totalorder %s1843_s27, 3 }
   0xd   : > { %p1933_p6 = por %p201_p3, %p45_p0  ;;  %s1845_s10 = smov [#allocation5]  }
   0xe   : > { %s2228_s30 = scalar_select %p1928_p4, 1, 0 }
   0xf   : > { %s2229_s8 = scalar_select %p1933_p6, 1, 0 }
  0x10   : > { %p1938_p8 = pnand %p1315_p5, %p208_p7  ;;  %s220_s11 = sshll.u32 %s1845_s10, 4  ;;  %s221_s11 = int_to_ptr.vmem [resolvable:$true] %s220_s11 }
  0x11   : > { %s1846_s13 = smov [#allocation7]   ;;  %s1676_s15 = scalar_lea.vmem %s221_s11, 4096 }
  0x12   : > { %s2230_s9 = scalar_select %p1938_p8, 1, 0 }
  0x13   : > { %p1524_p9 = pneg %p1938_p8  ;;  %s236_s14 = sshll.u32 %s1846_s13, 4  ;;  %s237_s14 = int_to_ptr.vmem [resolvable:$true] %s236_s14 }
  0x14   : > { %p1677_p13 = scmp.ne.s32.totalorder %s221_s11, %s1676_s15  ;;  %p1684_p5 = scmp.lt.s32.totalorder %s221_s11, %s221_s11 }
  0x15   : > { %p1947_p11 = pnand %p1524_p9, %p2223_p1  ;;  %p1685_p7 = scmp.lt.s32.totalorder %s1676_s15, %s1676_s15 }
  0x17   : > { %p1667_p12 = pneg %p1947_p11  ;;  %p1686_p10 = por %p1685_p7, %p1684_p5 }
  0x19   : > { %p1679_p0 = pnand %p1677_p13, %p1667_p12 }
  0x1b   : > { %p1680_p3 = pneg %p1679_p0 }
  0x1d   : > { %p1687_p9 = pnand %p1686_p10, %p1680_p3 }
  0x1f   : > { %1690 = shalt.err (!%p1687_p9)
}
  0x20   : > { %s1847_s16 = smov 128   ;;  %s1848_s17 = smov 8  }
  0x21   : > { %s2232_s1 = sld [smem:[#allocation15_spill]]  ;;  %s1702_s20 = scalar_lea.vmem %s237_s14, 2048 }
  0x22   : > { %p1703_p1 = scmp.ne.s32.totalorder %s237_s14, %s1702_s20  ;;  %p1710_p2 = scmp.lt.s32.totalorder %s237_s14, %s237_s14 }
  0x23   : > { %p1711_p6 = scmp.lt.s32.totalorder %s1702_s20, %s1702_s20 }
  0x24   : > { %p1705_p13 = pnand %p1703_p1, %p1667_p12 }
  0x25   : > { %p1712_p5 = por %p1711_p6, %p1710_p2 }
  0x26   : > { %p1706_p0 = pneg %p1705_p13 }
  0x27   : > { %1527 = dma.hbm_to_vmem [thread:$0]  (!%p1947_p11), %s2232_s1, 4096, %s221_s11, [#allocation6], %s1847_s16, %s1847_s16, %s1848_s17  }
  0x28   : > { %p1713_p10 = pnand %p1712_p5, %p1706_p0 }
  0x2a   : > { %1716 = shalt.err (!%p1713_p10)
}
  0x2b   : > { %s1849_s21 = smov 64   ;;  %s1850_s22 = smov 4  }
  0x2c   : > { %1530 = dma.hbm_to_vmem [thread:$0]  (!%p1947_p11), %s2218_s3, 2048, %s237_s14, [#allocation6], %s1849_s21, %s1849_s21, %s1850_s22  }
  0x2d   : > { %s1851_s10 = smov [#allocation8]   ;;  %s1970_s13 = sadd.s32 1, %s1843_s27  }
  0x2e   : > { %s252_s11 = sshll.u32 %s1851_s10, 4  ;;  %s253_s11 = int_to_ptr.vmem [resolvable:$true] %s252_s11 }
  0x2f   : > { %s1728_s15 = scalar_lea.vmem %s253_s11, 1024  ;;  %p1736_p3 = scmp.lt.s32.totalorder %s253_s11, %s253_s11 }
  0x30   : > { %p1729_p1 = scmp.ne.s32.totalorder %s253_s11, %s1728_s15  ;;  %p1737_p7 = scmp.lt.s32.totalorder %s1728_s15, %s1728_s15 }
  0x32   : > { %p1731_p2 = pnand %p1729_p1, %p1667_p12  ;;  %p1738_p9 = por %p1737_p7, %p1736_p3 }
  0x34   : > { %p1732_p6 = pneg %p1731_p2 }
  0x36   : > { %p1739_p13 = pnand %p1738_p9, %p1732_p6 }
  0x38   : > { %1742 = shalt.err (!%p1739_p13)
}
  0x39   : > { %1533 = dma.hbm_to_vmem [thread:$0]  (!%p1947_p11), %s2220_s5, 1024, %s253_s11, [#allocation9], %s1849_s21, %s1849_s21, %s1850_s22  }
  0x3a   : > { %s29_s17 = ssub.s32 %s1843_s27, %s1970_s13  ;;  %s32_s18 = sadd.s32 1, %s1839_s26 }
  0x3b   : > { %p30_p12 = scmp.eq.s32.totalorder %s29_s17, 0  ;;  %p39_p0 = scmp.ne.s32.totalorder %s1839_s26, %s1835_s25 }
  0x3c   : > { %p40_p5 = scmp.eq.s32.totalorder %s1843_s27, 0  ;;  %p1545_p10 = scmp.lt.s32.totalorder %s1843_s27, 2 }
  0x3d   : > { %s1988_s12 = scalar_select %p30_p12, %s1839_s26, %s32_s18  }
  0x3e   : > { %p41_p1 = por %p40_p5, %p39_p0  ;;  %p2233_p2 = scmp.eq.s32.totalorder %s1919_s28, 1 }
  0x3f   : > { %s269_s20 = sand.u32 1, %s1839_s26   ;;  %s1394_s23 = sshll.u32 %s1843_s27, 12 }
  0x40   : > { %p1992_p6 = por %p2233_p2, %p39_p0  ;;  %s1320_s29 = sshll.u32 %s269_s20, 8 }
  0x41   : > { %s2001_s21 = scalar_lea.hbm %s2215_s0, %s1394_s23  ;;  %s273_s22 = scalar_lea.vmem [#allocation2], %s1320_s29 }
  0x42   : > { %s2234_s19 = scalar_select %p1992_p6, 1, 0 }
  0x43   : > { %s281_s11 = sshll.u32 %s273_s22, 4  ;;  %p2003_p11 = pnand %p1545_p10, %p41_p1  ;;  %s2007_s11 = int_to_ptr.vmem [resolvable:$true] %s281_s11 }
  0x44   : > { %s2009_s14 = scalar_lea.sflag [#allocation3], %s269_s20  ;;  %s1743_s17 = scalar_lea.hbm %s2001_s21, 4096 }
  0x45   : > { %p1744_p3 = scmp.ne.s32.totalorder %s2001_s21, %s1743_s17  ;;  %p1745_p7 = pneg %p2003_p11 }
  0x46   : > { %s1748_s29 = scalar_lea.hbm %s2215_s0, 8192  ;;  %p1749_p12 = scmp.lt.s32.totalorder %s2001_s21, %s2215_s0 }
  0x47   : > { %p1746_p9 = pnand %p1745_p7, %p1744_p3  ;;  %p1750_p0 = scmp.lt.s32.totalorder %s1748_s29, %s1743_s17 }
  0x49   : > { %p1747_p13 = pneg %p1746_p9  ;;  %p1751_p5 = por %p1750_p0, %p1749_p12 }
  0x4b   : > { %p1752_p10 = pnand %p1751_p5, %p1747_p13 }
  0x4d   : > { %1755 = shalt.err (!%p1752_p10)
}
  0x4e   : > { %s1756_s20 = scalar_lea.vmem %s2007_s11, 4096  ;;  %s1852_s22 = smov [#allocation2]  }
  0x4f   : > { %p1757_p1 = scmp.ne.s32.totalorder %s2007_s11, %s1756_s20  ;;  %s1761_s1 = sshll.u32 %s1852_s22, 4  ;;  %s1762_s1 = int_to_ptr.vmem [resolvable:$false] %s1761_s1 }
  0x50   : > { %s1763_s18 = scalar_lea.vmem %s1762_s1, 8192  ;;  %p1764_p9 = scmp.lt.s32.totalorder %s2007_s11, %s1762_s1 }
  0x51   : > { %p1759_p2 = pnand %p1757_p1, %p1745_p7  ;;  %p1765_p6 = scmp.lt.s32.totalorder %s1763_s18, %s1756_s20 }
  0x53   : > { %p1760_p3 = pneg %p1759_p2  ;;  %p1766_p4 = por %p1765_p6, %p1764_p9 }
  0x55   : > { %p1767_p8 = pnand %p1766_p4, %p1760_p3 }
  0x57   : > { %1770 = shalt.err (!%p1767_p8)
}
  0x58   : > { %s1853_s17 = smov 256   ;;  %s1854_s23 = smov 16  }
  0x59   : > { %1537 = dma.hbm_to_vmem [thread:$0]  (!%p2003_p11), %s2001_s21, 4096, %s2007_s11, %s2009_s14, %s1853_s17, %s1853_s17, %s1854_s23  }
  0x5a   : > { %p2236_p7 = scmp.ne.s32.totalorder %s2230_s9, 0 }
  0x5b   : > { %s2033_s29 = sand.u32 (!%p2236_p7), 1, %s1835_s25   ;;  %p2237_p4 = scmp.ne.s32.totalorder (!%p2236_p7), %s2228_s30, 0 }
  0x5c   : > { %293 = sbr.rel (%p2236_p7) target bundleno = 854 (0x356), region = 48  ;;  %s1325_s1 = sshll.u32 (!%p2236_p7), %s2033_s29, 8 }
  0x5d   : > { %s296_s10 = scalar_lea.sflag (!%p2236_p7), [#allocation3], %s2033_s29  ;;  %s2037_s15 = scalar_lea.vmem (!%p2236_p7), [#allocation2], %s1325_s1 }
  0x61   : > { %1814 = dma.done.wait (%p2237_p4), %s296_s10, 4096  }
  0x62   : > { %1816 = vsyncadd (%p2237_p4), %s296_s10, 4294963200  ;;  %p2238_p8 = scmp.eq.s32.totalorder %s1919_s28, 0 }
  0x64   : > { %1818 = dma.done.wait (%p2238_p8), [#allocation6], 6144   ;;  %p2239_p6 = pmov %p2238_p8 }
  0x66   : > { %1820 = vsyncadd (%p2239_p6), [#allocation6], 4294961152  ;;  %p2240_p11 = pmov %p2239_p6 }
  0x67   : > { %p2241_p13 = pmov %p2239_p6 }
  0x68   : > { %1822 = dma.done.wait (%p2240_p11), [#allocation9], 1024  }
  0x69   : > { %1824 = vsyncadd (%p2241_p13), [#allocation9], 4294966272  ;;  %v1593_v0 = vld [vmem:[#allocation5 + $0x74] ss:$8 sps:$4 sm:$0xff]   ;;  %v1595_v1 = vld [vmem:[#allocation5 + $0x70] ss:$8 sps:$4 sm:$0xff]  }
  0x6a   : > { %597 = vmatprep.subr.bf16.mxu0 %v1593_v0  ;;  %v1596_v2 = vld [vmem:[#allocation5 + $0x64] ss:$8 sps:$4 sm:$0xff]   ;;  %v1598_v3 = vld [vmem:[#allocation5 + $0x60] ss:$8 sps:$4 sm:$0xff]   ;;  %v1599_v4 = vld [vmem:[#allocation5 + $0x54] ss:$8 sps:$4 sm:$0xff]  }
  0x6b   : > { %598 = vmatpush1.bf16.msra.mxu0 %v1595_v1  ;;  %v1601_v5 = vld [vmem:[#allocation5 + $0x50] ss:$8 sps:$4 sm:$0xff]   ;;  %v1602_v6 = vld [vmem:[#allocation5 + $0x44] ss:$8 sps:$4 sm:$0xff]   ;;  %v1604_v7 = vld [vmem:[#allocation5 + $0x40] ss:$8 sps:$4 sm:$0xff]  }
  0x6c   : > { %599 = vmatprep.subr.bf16.mxu0 %v1596_v2  ;;  %v1605_v8 = vld [vmem:[#allocation5 + $0x34] ss:$8 sps:$4 sm:$0xff]   ;;  %v1607_v9 = vld [vmem:[#allocation5 + $0x30] ss:$8 sps:$4 sm:$0xff]   ;;  %v1608_v10 = vld [vmem:[#allocation5 + $0x24] ss:$8 sps:$4 sm:$0xff]  }
  0x6d   : > { %v1610_v11 = vld [vmem:[#allocation5 + $0x20] ss:$8 sps:$4 sm:$0xff]   ;;  %v1611_v12 = vld [vmem:[#allocation5 + $0x14] ss:$8 sps:$4 sm:$0xff]   ;;  %v1613_v16 = vld [vmem:[#allocation5 + $0x10] ss:$8 sps:$4 sm:$0xff]  }
  0x6e   : > { %v346_v13 = vld [vmem:[%s2037_s15 + $0x8] sm:$0xff]  ;;  %v348_v14 = vld [vmem:[%s2037_s15 + $0x18] sm:$0xff]  ;;  %v1643_v26 = vld [vmem:[#allocation7 + $0x70] sm:$0xff]   ;;  %s1329_s16 = sshll.u32 %s2033_s29, 7  ;;  %s1395_s18 = sshll.u32 %s1919_s28, 11 }
  0x6f   : > { %600 = vmatpush1.bf16.msra.mxu0 %v1598_v3  ;;  %v378_v15 = vpack.c.bf16 %v348_v14, %v346_v13  ;;  %v1614_v17 = vld [vmem:[#allocation5 + $0x4] ss:$8 sps:$4 sm:$0xff]   ;;  %v1616_v18 = vld [vmem:[#allocation5] ss:$8 sps:$4 sm:$0xff]   ;;  %v1617_v19 = vld [vmem:[#allocation5 + $0xf4] ss:$8 sps:$4 sm:$0xff]   ;;  %s2168_s10 = scalar_lea.hbm %s2222_s7, %s1395_s18 }
  0x70   : > { %601 = vmatprep.subr.bf16.mxu0 %v1599_v4  ;;  %v1619_v20 = vld [vmem:[#allocation5 + $0xf0] ss:$8 sps:$4 sm:$0xff]   ;;  %v1620_v21 = vld [vmem:[#allocation5 + $0xe4] ss:$8 sps:$4 sm:$0xff]   ;;  %v1622_v23 = vld [vmem:[#allocation5 + $0xe0] ss:$8 sps:$4 sm:$0xff]  }
  0x71   : > { %629 = vmatprep.mubr.bf16.mxu0 %v378_v15  ;;  %v1641_v22 = vld [vmem:[#allocation7 + $0x78] sm:$0xff]   ;;  %v1644_v27 = vld [vmem:[#allocation7 + $0x30] sm:$0xff]   ;;  %v1645_v28 = vld [vmem:[#allocation7 + $0x68] sm:$0xff]   ;;  %s2147_s22 = scalar_lea.vmem [#allocation10], %s1329_s16  ;;  %p2242_p0 = scmp.ne.s32.totalorder %s2234_s19, 0 }
  0x72   : > { %v1642_v24 = vld [vmem:[#allocation7 + $0x38] sm:$0xff]   ;;  %1396 = vmatprep.subr.bf16.mxu1 %v1641_v22  ;;  %v1626_v30 = vld [vmem:[#allocation5 + $0xc4] ss:$8 sps:$4 sm:$0xff]   ;;  %v1628_v33 = vld [vmem:[#allocation5 + $0xc0] ss:$8 sps:$4 sm:$0xff]   ;;  %s1212_s17 = sshll.u32 %s2147_s22, 4  ;;  %s2170_s17 = int_to_ptr.vmem [resolvable:$true] %s1212_s17 }
  0x73   : > { %602 = vmatpush1.bf16.msra.mxu0 %v1601_v5  ;;  %v1623_v25 = vld [vmem:[#allocation5 + $0xd4] ss:$8 sps:$4 sm:$0xff]   ;;  %1397 = vmatpush3.bf16.msra.mxu1 %v1642_v24  ;;  %v1625_v29 = vld [vmem:[#allocation5 + $0xd0] ss:$8 sps:$4 sm:$0xff]   ;;  %v1646_v31 = vld [vmem:[#allocation7 + $0x28] sm:$0xff]   ;;  %s1771_s28 = scalar_lea.vmem %s2170_s17, 2048 }
  0x74   : > { %603 = vmatprep.subr.bf16.mxu0 %v1602_v6  ;;  %1398 = vmatprep.subr.bf16.mxu1 %v1643_v26  ;;  %v1647_v32 = vld [vmem:[#allocation7 + $0x60] sm:$0xff]   ;;  %v1629_v35 = vld [vmem:[#allocation5 + $0xb4] ss:$8 sps:$4 sm:$0xff]   ;;  %v1631_v37 = vld [vmem:[#allocation5 + $0xb0] ss:$8 sps:$4 sm:$0xff]   ;;  %p1772_p12 = scmp.ne.s32.totalorder %s2170_s17, %s1771_s28  ;;  %s1855_s30 = smov [#allocation10]  }
  0x75   : > { %v1648_v34 = vld [vmem:[#allocation7 + $0x20] sm:$0xff]   ;;  %v1649_v36 = vld [vmem:[#allocation7 + $0x58] sm:$0xff]   ;;  %v347_v46 = vld [vmem:[%s2037_s15 + $0x10] sm:$0xff]  ;;  %s1775_s9 = sshll.u32 %s1855_s30, 4  ;;  %s1776_s9 = int_to_ptr.vmem [resolvable:$false] %s1775_s9 }
  0x76   : > { %v1650_v38 = vld [vmem:[#allocation7 + $0x18] sm:$0xff]   ;;  %v1632_v39 = vld [vmem:[#allocation5 + $0xa4] ss:$8 sps:$4 sm:$0xff]   ;;  %v1634_v40 = vld [vmem:[#allocation5 + $0xa0] ss:$8 sps:$4 sm:$0xff]   ;;  %p1773_p5 = pnand %p1772_p12, %p2242_p0  ;;  %s1777_s21 = scalar_lea.vmem %s1776_s9, 4096 }
  0x77   : > { %604 = vmatpush1.bf16.msra.mxu0 %v1604_v7  ;;  %1399 = vmatpush3.bf16.msra.mxu1 %v1644_v27  ;;  %v1635_v41 = vld [vmem:[#allocation5 + $0x94] ss:$8 sps:$4 sm:$0xff]   ;;  %v1637_v42 = vld [vmem:[#allocation5 + $0x90] ss:$8 sps:$4 sm:$0xff]   ;;  %v1638_v43 = vld [vmem:[#allocation5 + $0x84] ss:$8 sps:$4 sm:$0xff]   ;;  %p1778_p1 = scmp.lt.s32.totalorder %s2170_s17, %s1776_s9  ;;  %p1779_p2 = scmp.lt.s32.totalorder %s1777_s21, %s1771_s28 }
  0x78   : > { %605 = vmatprep.subr.bf16.mxu0 %v1605_v8  ;;  %1400 = vmatprep.subr.bf16.mxu1 %v1645_v28  ;;  %v1640_v44 = vld [vmem:[#allocation5 + $0x80] ss:$8 sps:$4 sm:$0xff]   ;;  %v352_v48 = vld [vmem:[%s2037_s15 + $0x38] sm:$0xff]  ;;  %v351_v52 = vld [vmem:[%s2037_s15 + $0x30] sm:$0xff]  ;;  %p1774_p10 = pneg %p1773_p5 }
  0x79   : > { %v345_v45 = vld [vmem:[%s2037_s15] sm:$0xff]  ;;  %v350_v47 = vld [vmem:[%s2037_s15 + $0x28] sm:$0xff]  ;;  %v356_v54 = vld [vmem:[%s2037_s15 + $0x58] sm:$0xff]  ;;  %p1780_p3 = por %p1779_p2, %p1778_p1 }
  0x7a   : > { %v377_v49 = vpack.c.bf16 %v347_v46, %v345_v45  ;;  %v380_v50 = vpack.c.bf16 %v352_v48, %v350_v47  ;;  %v349_v51 = vld [vmem:[%s2037_s15 + $0x20] sm:$0xff]  ;;  %v354_v53 = vld [vmem:[%s2037_s15 + $0x48] sm:$0xff]  ;;  %v355_v58 = vld [vmem:[%s2037_s15 + $0x50] sm:$0xff] }
  0x7b   : > { %606 = vmatpush1.bf16.msra.mxu0 %v1607_v9  ;;  %1401 = vmatpush3.bf16.msra.mxu1 %v1646_v31  ;;  %v379_v55 = vpack.c.bf16 %v351_v52, %v349_v51  ;;  %v382_v56 = vpack.c.bf16 %v356_v54, %v354_v53  ;;  %v353_v57 = vld [vmem:[%s2037_s15 + $0x40] sm:$0xff]  ;;  %v358_v59 = vld [vmem:[%s2037_s15 + $0x68] sm:$0xff]  ;;  %v360_v60 = vld [vmem:[%s2037_s15 + $0x78] sm:$0xff]  ;;  %p1781_p9 = pnand %p1780_p3, %p1774_p10 }
  0x7c   : > { %607 = vmatprep.subr.bf16.mxu0 %v1608_v10  ;;  %1402 = vmatprep.subr.bf16.mxu1 %v1647_v32  ;;  %v381_v61 = vpack.c.bf16 %v355_v58, %v353_v57  ;;  %v384_v62 = vpack.c.bf16 %v360_v60, %v358_v59  ;;  %v357_v63 = vld [vmem:[%s2037_s15 + $0x60] sm:$0xff]  ;;  %v359_v0 = vld [vmem:[%s2037_s15 + $0x70] sm:$0xff]  ;;  %v362_v1 = vld [vmem:[%s2037_s15 + $0x88] sm:$0xff] }
  0x7d   : > { %v364_v2 = vld [vmem:[%s2037_s15 + $0x98] sm:$0xff]  ;;  %v383_v3 = vpack.c.bf16 %v359_v0, %v357_v63  ;;  %v361_v5 = vld [vmem:[%s2037_s15 + $0x80] sm:$0xff]  ;;  %v363_v6 = vld [vmem:[%s2037_s15 + $0x90] sm:$0xff] }
  0x7e   : > { %v386_v4 = vpack.c.bf16 %v364_v2, %v362_v1  ;;  %v366_v7 = vld [vmem:[%s2037_s15 + $0xa8] sm:$0xff]  ;;  %v368_v8 = vld [vmem:[%s2037_s15 + $0xb8] sm:$0xff]  ;;  %v385_v9 = vpack.c.bf16 %v363_v6, %v361_v5  ;;  %v375_v24 = vld [vmem:[%s2037_s15 + $0xf0] sm:$0xff] }
  0x7f   : > { %608 = vmatpush1.bf16.msra.mxu0 %v1610_v11  ;;  %1403 = vmatpush3.bf16.msra.mxu1 %v1648_v34  ;;  %v388_v10 = vpack.c.bf16 %v368_v8, %v366_v7  ;;  %v365_v11 = vld [vmem:[%s2037_s15 + $0xa0] sm:$0xff]  ;;  %v370_v13 = vld [vmem:[%s2037_s15 + $0xc8] sm:$0xff]  ;;  %v372_v14 = vld [vmem:[%s2037_s15 + $0xd8] sm:$0xff] }
  0x80   : > { %609 = vmatprep.subr.bf16.mxu0 %v1611_v12  ;;  %1404 = vmatprep.subr.bf16.mxu1 %v1649_v36  ;;  %v367_v12 = vld [vmem:[%s2037_s15 + $0xb0] sm:$0xff]  ;;  %v1653_v28 = vld [vmem:[#allocation7 + $0x48] sm:$0xff]   ;;  %v1656_v31 = vld [vmem:[#allocation7] sm:$0xff]  }
  0x81   : > { %v387_v15 = vpack.c.bf16 %v367_v12, %v365_v11  ;;  %v1651_v26 = vld [vmem:[#allocation7 + $0x50] sm:$0xff]   ;;  %v1657_v32 = vld [vmem:[#allocation8 + $0x38] sm:$0xff]   ;;  %v1659_v1 = vld [vmem:[#allocation8 + $0x28] sm:$0xff]  }
  0x82   : > { %v1652_v27 = vld [vmem:[#allocation7 + $0x10] sm:$0xff]  }
  0x83   : > { %610 = vmatpush1.bf16.msra.mxu0 %v1613_v16  ;;  %1405 = vmatpush3.bf16.msra.mxu1 %v1650_v38  ;;  %v390_v16 = vpack.c.bf16 %v372_v14, %v370_v13  ;;  %v1658_v57 = vld [vmem:[#allocation8 + $0x30] sm:$0xff]  }
  0x84   : > { %611 = vmatprep.subr.bf16.mxu0 %v1614_v17  ;;  %v369_v17 = vld [vmem:[%s2037_s15 + $0xc0] sm:$0xff]  ;;  %1406 = vmatprep.subr.bf16.mxu1 %v1651_v26 }
  0x87   : > { %612 = vmatpush1.bf16.msra.mxu0 %v1616_v18  ;;  %v371_v18 = vld [vmem:[%s2037_s15 + $0xd0] sm:$0xff]  ;;  %1407 = vmatpush3.bf16.msra.mxu1 %v1652_v27 }
  0x88   : > { %613 = vmatprep.subr.bf16.mxu0 %v1617_v19  ;;  %v374_v19 = vld [vmem:[%s2037_s15 + $0xe8] sm:$0xff]  ;;  %1408 = vmatprep.subr.bf16.mxu1 %v1653_v28 }
  0x8b   : > { %614 = vmatpush2.bf16.msra.mxu0 %v1619_v20  ;;  %v376_v20 = vld [vmem:[%s2037_s15 + $0xf8] sm:$0xff] }
  0x8c   : > { %615 = vmatprep.subr.bf16.mxu0 %v1620_v21  ;;  %v389_v21 = vpack.c.bf16 %v371_v18, %v369_v17  ;;  %v392_v22 = vpack.c.bf16 %v376_v20, %v374_v19 }
  0x8f   : > { %616 = vmatpush2.bf16.msra.mxu0 %v1622_v23  ;;  %v373_v23 = vld [vmem:[%s2037_s15 + $0xe0] sm:$0xff]  ;;  %s1199_s15 = scalar_lea.sflag [#allocation4], %s2033_s29 }
  0x90   : > { %617 = vmatprep.subr.bf16.mxu0 %v1623_v25  ;;  %v391_v25 = vpack.c.bf16 %v375_v24, %v373_v23 }
  0x93   : > { %618 = vmatpush2.bf16.msra.mxu0 %v1625_v29  ;;  %v1654_v29 = vld [vmem:[#allocation7 + $0x8] sm:$0xff]  }
  0x94   : > { %619 = vmatprep.subr.bf16.mxu0 %v1626_v30  ;;  %1409 = vmatpush3.bf16.msra.mxu1 %v1654_v29  ;;  %v1655_v30 = vld [vmem:[#allocation7 + $0x40] sm:$0xff]  }
  0x95   : > { %1410 = vmatprep.subr.bf16.mxu1 %v1655_v30 }
  0x97   : > { %620 = vmatpush2.bf16.msra.mxu0 %v1628_v33  ;;  %v427_v33 = vlaneseq }
  0x98   : > { %621 = vmatprep.subr.bf16.mxu0 %v1629_v35  ;;  %1411 = vmatpush3.bf16.msra.mxu1 %v1656_v31 }
  0x99   : > { %1476 = vmatprep.subr.bf16.mxu1 %v1657_v32  ;;  %v428_v34 = vshrl.u32 %v427_v33, 7 }
  0x9b   : > { %622 = vmatpush2.bf16.msra.mxu0 %v1631_v37  ;;  %v433_v35 = vsub.s32 1, %v428_v34  ;;  %v429_v36 = vsub.s32 0, %v428_v34  ;;  %v425_v37 = vld [vmem:[%s2217_s2] sm:$0x3] }
  0x9c   : > { %623 = vmatprep.subr.bf16.mxu0 %v1632_v39 }
  0x9d   : > { %v2086_v39 = vrot.slane %v425_v37, %v433_v35 }
  0x9f   : > { %624 = vmatpush2.bf16.msra.mxu0 %v1634_v40  ;;  %v2088_v40 = vrot.slane %v425_v37, %v429_v36 }
  0xa0   : > { %625 = vmatprep.subr.bf16.mxu0 %v1635_v41 }
  0xa3   : > { %626 = vmatpush2.bf16.msra.mxu0 %v1637_v42 }
  0xa4   : > { %627 = vmatprep.subr.bf16.mxu0 %v1638_v43 }
  0xa7   : > { %628 = vmatpush2.bf16.msra.mxu0 %v1640_v44 }
  0xaa   : > { %630 = vmatmul.mubr.bf16.vlgmr.msra.gmra.mxu0 %v377_v49 }
  0xab   : > { %639 = vmatprep.mubr.bf16.mxu0 %v380_v50 }
  0xb2   : > { %640 = vmatmul.mubr.bf16.gmra.mxu0 %v379_v55 }
  0xb3   : > { %649 = vmatprep.mubr.bf16.mxu0 %v382_v56 }
  0xba   : > { %650 = vmatmul.mubr.bf16.gmra.mxu0 %v381_v61 }
  0xbb   : > { %659 = vmatprep.mubr.bf16.mxu0 %v384_v62 }
  0xc2   : > { %660 = vmatmul.mubr.bf16.gmra.mxu0 %v383_v3 }
  0xc3   : > { %669 = vmatprep.mubr.bf16.mxu0 %v386_v4 }
  0xca   : > { %670 = vmatmul.mubr.bf16.gmra.mxu0 %v385_v9 }
  0xcb   : > { %679 = vmatprep.mubr.bf16.mxu0 %v388_v10 }
  0xd2   : > { %680 = vmatmul.mubr.bf16.gmra.mxu0 %v387_v15 }
  0xd3   : > { %689 = vmatprep.mubr.bf16.mxu0 %v390_v16 }
  0xda   : > { %690 = vmatmul.mubr.bf16.gmra.mxu0 %v389_v21 }
  0xdb   : > { %699 = vmatprep.mubr.bf16.mxu0 %v392_v22 }
  0xe2   : > { %700 = vmatmul.mubr.bf16.gmra.mxu0 %v391_v25 }
 0x16a   : > { %v631_v38 = vpop.f32.mrf.mxu0 }
 0x16b   : > { %v632_v45 = vadd.f32 %v631_v38, %v2088_v40 }
 0x16c   : > { %v633_v41 = vpop.f32.mrf.mxu0 }
 0x16d   : > { %v634_v43 = vadd.f32 %v633_v41, %v2086_v39  ;;  %v710_v52 = vmax.f32 %v632_v45, 0.0 }
 0x16e   : > { %v635_v42 = vpop.f32.mrf.mxu0 }
 0x16f   : > { %v636_v44 = vadd.f32 %v635_v42, %v2088_v40  ;;  %v711_v50 = vmax.f32 %v634_v43, 0.0 }
 0x170   : > { %v637_v46 = vpop.f32.mrf.mxu0 }
 0x171   : > { %v638_v47 = vadd.f32 %v637_v46, %v2086_v39  ;;  %v712_v48 = vmax.f32 %v636_v44, 0.0 }
 0x172   : > { %v641_v49 = vpop.f32.mrf.mxu0 }
 0x173   : > { %v713_v51 = vmax.f32 %v638_v47, 0.0  ;;  %v742_v55 = vpack.c.bf16 %v712_v48, %v710_v52  ;;  %v642_v60 = vadd.f32 %v641_v49, %v2088_v40 }
 0x174   : > { %v643_v53 = vpop.f32.mrf.mxu0 }
 0x175   : > { %v743_v54 = vpack.c.bf16 %v713_v51, %v711_v50  ;;  %v644_v58 = vadd.f32 %v643_v53, %v2086_v39  ;;  %v714_v4 = vmax.f32 %v642_v60, 0.0 }
 0x176   : > { %v645_v56 = vpop.f32.mrf.mxu0 }
 0x177   : > { %v646_v59 = vadd.f32 %v645_v56, %v2088_v40  ;;  %925 = vmatprep.mubr.bf16.mxu1 %v743_v54  ;;  %v715_v2 = vmax.f32 %v644_v58, 0.0 }
 0x178   : > { %v647_v61 = vpop.f32.mrf.mxu0  ;;  %926 = vmatmul.mubr.bf16.vlgmr.msra.gmra.mxu1 %v742_v55 }
 0x179   : > { %v648_v62 = vadd.f32 %v647_v61, %v2086_v39  ;;  %1477 = vmatpush3.bf16.msra.mxu1 %v1657_v32  ;;  %v716_v63 = vmax.f32 %v646_v59, 0.0 }
 0x17a   : > { %v651_v0 = vpop.f32.mrf.mxu0  ;;  %1478 = vmatprep.subr.bf16.mxu1 %v1658_v57 }
 0x17b   : > { %v717_v3 = vmax.f32 %v648_v62, 0.0  ;;  %v744_v7 = vpack.c.bf16 %v716_v63, %v714_v4  ;;  %v652_v11 = vadd.f32 %v651_v0, %v2088_v40 }
 0x17c   : > { %v653_v5 = vpop.f32.mrf.mxu0 }
 0x17d   : > { %v745_v6 = vpack.c.bf16 %v717_v3, %v715_v2  ;;  %1479 = vmatpush3.bf16.msra.mxu1 %v1658_v57  ;;  %v654_v9 = vadd.f32 %v653_v5, %v2086_v39  ;;  %v718_v18 = vmax.f32 %v652_v11, 0.0 }
 0x17e   : > { %v655_v8 = vpop.f32.mrf.mxu0  ;;  %1480 = vmatprep.subr.bf16.mxu1 %v1659_v1 }
 0x17f   : > { %v656_v10 = vadd.f32 %v655_v8, %v2088_v40  ;;  %933 = vmatprep.mubr.bf16.mxu1 %v745_v6  ;;  %v719_v16 = vmax.f32 %v654_v9, 0.0 }
 0x180   : > { %v657_v12 = vpop.f32.mrf.mxu0  ;;  %934 = vmatmul.mubr.bf16.gmra.mxu1 %v744_v7 }
 0x181   : > { %v658_v13 = vadd.f32 %v657_v12, %v2086_v39  ;;  %1481 = vmatpush3.bf16.msra.mxu1 %v1659_v1  ;;  %v720_v14 = vmax.f32 %v656_v10, 0.0 }
 0x182   : > { %v661_v15 = vpop.f32.mrf.mxu0 }
 0x183   : > { %v721_v17 = vmax.f32 %v658_v13, 0.0  ;;  %v746_v21 = vpack.c.bf16 %v720_v14, %v718_v18  ;;  %v662_v25 = vadd.f32 %v661_v15, %v2088_v40 }
 0x184   : > { %v663_v19 = vpop.f32.mrf.mxu0 }
 0x185   : > { %v747_v20 = vpack.c.bf16 %v721_v17, %v719_v16  ;;  %v664_v23 = vadd.f32 %v663_v19, %v2086_v39  ;;  %v722_v32 = vmax.f32 %v662_v25, 0.0 }
 0x186   : > { %v665_v22 = vpop.f32.mrf.mxu0 }
 0x187   : > { %v666_v24 = vadd.f32 %v665_v22, %v2088_v40  ;;  %941 = vmatprep.mubr.bf16.mxu1 %v747_v20  ;;  %v723_v30 = vmax.f32 %v664_v23, 0.0 }
 0x188   : > { %v667_v26 = vpop.f32.mrf.mxu0  ;;  %942 = vmatmul.mubr.bf16.gmra.mxu1 %v746_v21 }
 0x189   : > { %v668_v27 = vadd.f32 %v667_v26, %v2086_v39  ;;  %v724_v28 = vmax.f32 %v666_v24, 0.0 }
 0x18a   : > { %v671_v29 = vpop.f32.mrf.mxu0 }
 0x18b   : > { %v725_v31 = vmax.f32 %v668_v27, 0.0  ;;  %v748_v35 = vpack.c.bf16 %v724_v28, %v722_v32  ;;  %v672_v41 = vadd.f32 %v671_v29, %v2088_v40  ;;  %v1660_v28 = vld [vmem:[#allocation8 + $0x20] sm:$0xff]   ;;  %v1661_v29 = vld [vmem:[#allocation8 + $0x18] sm:$0xff]  }
 0x18c   : > { %v673_v33 = vpop.f32.mrf.mxu0  ;;  %1482 = vmatprep.subr.bf16.mxu1 %v1660_v28 }
 0x18d   : > { %v749_v34 = vpack.c.bf16 %v725_v31, %v723_v30  ;;  %v674_v37 = vadd.f32 %v673_v33, %v2086_v39  ;;  %v726_v48 = vmax.f32 %v672_v41, 0.0  ;;  %1483 = vmatpush3.bf16.msra.mxu1 %v1660_v28  ;;  %v1662_v30 = vld [vmem:[#allocation8 + $0x10] sm:$0xff]  }
 0x18e   : > { %v675_v36 = vpop.f32.mrf.mxu0  ;;  %1484 = vmatprep.subr.bf16.mxu1 %v1661_v29 }
 0x18f   : > { %v676_v38 = vadd.f32 %v675_v36, %v2088_v40  ;;  %949 = vmatprep.mubr.bf16.mxu1 %v749_v34  ;;  %v727_v46 = vmax.f32 %v674_v37, 0.0  ;;  %v2125_v34 = vld [vmem:[%s2219_s4] ss:$0 sm:$0xff] }
 0x190   : > { %v677_v42 = vpop.f32.mrf.mxu0  ;;  %950 = vmatmul.mubr.bf16.gmra.mxu1 %v748_v35 }
 0x191   : > { %v678_v43 = vadd.f32 %v677_v42, %v2086_v39  ;;  %v728_v44 = vmax.f32 %v676_v38, 0.0  ;;  %1485 = vmatpush3.bf16.msra.mxu1 %v1661_v29 }
 0x192   : > { %v681_v45 = vpop.f32.mrf.mxu0  ;;  %1486 = vmatprep.subr.bf16.mxu1 %v1662_v30 }
 0x193   : > { %v729_v47 = vmax.f32 %v678_v43, 0.0  ;;  %v750_v51 = vpack.c.bf16 %v728_v44, %v726_v48  ;;  %v682_v55 = vadd.f32 %v681_v45, %v2088_v40 }
 0x194   : > { %v683_v49 = vpop.f32.mrf.mxu0 }
 0x195   : > { %v751_v50 = vpack.c.bf16 %v729_v47, %v727_v46  ;;  %v684_v53 = vadd.f32 %v683_v49, %v2086_v39  ;;  %v730_v62 = vmax.f32 %v682_v55, 0.0  ;;  %1487 = vmatpush3.bf16.msra.mxu1 %v1662_v30 }
 0x196   : > { %v685_v52 = vpop.f32.mrf.mxu0 }
 0x197   : > { %v686_v54 = vadd.f32 %v685_v52, %v2088_v40  ;;  %957 = vmatprep.mubr.bf16.mxu1 %v751_v50  ;;  %v731_v60 = vmax.f32 %v684_v53, 0.0 }
 0x198   : > { %v687_v56 = vpop.f32.mrf.mxu0  ;;  %958 = vmatmul.mubr.bf16.gmra.mxu1 %v750_v51 }
 0x199   : > { %v688_v57 = vadd.f32 %v687_v56, %v2086_v39  ;;  %v732_v58 = vmax.f32 %v686_v54, 0.0 }
 0x19a   : > { %v691_v59 = vpop.f32.mrf.mxu0 }
 0x19b   : > { %v733_v61 = vmax.f32 %v688_v57, 0.0  ;;  %v752_v1 = vpack.c.bf16 %v732_v58, %v730_v62  ;;  %v692_v5 = vadd.f32 %v691_v59, %v2088_v40 }
 0x19c   : > { %v693_v63 = vpop.f32.mrf.mxu0 }
 0x19d   : > { %v753_v0 = vpack.c.bf16 %v733_v61, %v731_v60  ;;  %v694_v3 = vadd.f32 %v693_v63, %v2086_v39  ;;  %v734_v12 = vmax.f32 %v692_v5, 0.0 }
 0x19e   : > { %v695_v2 = vpop.f32.mrf.mxu0 }
 0x19f   : > { %v696_v4 = vadd.f32 %v695_v2, %v2088_v40  ;;  %965 = vmatprep.mubr.bf16.mxu1 %v753_v0  ;;  %v735_v10 = vmax.f32 %v694_v3, 0.0 }
 0x1a0   : > { %v697_v6 = vpop.f32.mrf.mxu0  ;;  %966 = vmatmul.mubr.bf16.gmra.mxu1 %v752_v1 }
 0x1a1   : > { %v698_v7 = vadd.f32 %v697_v6, %v2086_v39  ;;  %v736_v8 = vmax.f32 %v696_v4, 0.0 }
 0x1a2   : > { %v701_v9 = vpop.f32.mrf.mxu0 }
 0x1a3   : > { %v737_v11 = vmax.f32 %v698_v7, 0.0  ;;  %v754_v15 = vpack.c.bf16 %v736_v8, %v734_v12  ;;  %v702_v19 = vadd.f32 %v701_v9, %v2088_v40 }
 0x1a4   : > { %v703_v13 = vpop.f32.mrf.mxu0 }
 0x1a5   : > { %v755_v14 = vpack.c.bf16 %v737_v11, %v735_v10  ;;  %v704_v17 = vadd.f32 %v703_v13, %v2086_v39  ;;  %v738_v25 = vmax.f32 %v702_v19, 0.0 }
 0x1a6   : > { %v705_v16 = vpop.f32.mrf.mxu0 }
 0x1a7   : > { %v706_v18 = vadd.f32 %v705_v16, %v2088_v40  ;;  %973 = vmatprep.mubr.bf16.mxu1 %v755_v14  ;;  %v739_v23 = vmax.f32 %v704_v17, 0.0  ;;  %v1663_v40 = vld [vmem:[#allocation8 + $0x8] sm:$0xff]  }
 0x1a8   : > { %v707_v20 = vpop.f32.mrf.mxu0  ;;  %974 = vmatmul.mubr.bf16.gmra.mxu1 %v754_v15  ;;  %1488 = vmatprep.subr.bf16.mxu1 %v1663_v40 }
 0x1a9   : > { %v708_v21 = vadd.f32 %v707_v20, %v2086_v39  ;;  %v740_v22 = vmax.f32 %v706_v18, 0.0  ;;  %1489 = vmatpush3.bf16.msra.mxu1 %v1663_v40  ;;  %v1664_v39 = vld [vmem:[#allocation8] sm:$0xff]  }
 0x1aa   : > { %1490 = vmatprep.subr.bf16.mxu1 %v1664_v39 }
 0x1ab   : > { %v741_v24 = vmax.f32 %v708_v21, 0.0  ;;  %v756_v27 = vpack.c.bf16 %v740_v22, %v738_v25 }
 0x1ad   : > { %v757_v26 = vpack.c.bf16 %v741_v24, %v739_v23  ;;  %1491 = vmatpush3.bf16.msra.mxu1 %v1664_v39 }
 0x1af   : > { %981 = vmatprep.mubr.bf16.mxu1 %v757_v26 }
 0x1b0   : > { %982 = vmatmul.mubr.bf16.gmra.mxu1 %v756_v27 }
 0x238   : > { %v1412_v31 = vpop.f32.mrf.mxu1 }
 0x23a   : > { %v1413_v32 = vpop.f32.mrf.mxu1 }
 0x23b   : > { %v1414_v33 = vadd.f32 %v1413_v32, %v1412_v31 }
 0x23c   : > { %v1415_v35 = vpop.f32.mrf.mxu1 }
 0x23d   : > { %v928_v37 = vadd.f32 %v1414_v33, %v2125_v34 }
 0x23e   : > { %v1416_v36 = vpop.f32.mrf.mxu1 }
 0x23f   : > { %v1417_v38 = vadd.f32 %v1416_v36, %v1415_v35  ;;  %v990_v44 = vmax.f32 %v928_v37, 0.0 }
 0x240   : > { %v1418_v41 = vpop.f32.mrf.mxu1 }
 0x241   : > { %v931_v42 = vadd.f32 %v1417_v38, %v2125_v34 }
 0x242   : > { %v1419_v43 = vpop.f32.mrf.mxu1 }
 0x243   : > { %v991_v45 = vmax.f32 %v931_v42, 0.0  ;;  %v1420_v46 = vadd.f32 %v1419_v43, %v1418_v41 }
 0x244   : > { %v1421_v47 = vpop.f32.mrf.mxu1 }
 0x245   : > { %v1006_v48 = vpack.c.bf16 %v991_v45, %v990_v44  ;;  %v936_v50 = vadd.f32 %v1420_v46, %v2125_v34 }
 0x246   : > { %v1422_v49 = vpop.f32.mrf.mxu1 }
 0x247   : > { %v1423_v51 = vadd.f32 %v1422_v49, %v1421_v47  ;;  %1492 = vmatprep.mubr.bf16.mxu1 %v1006_v48  ;;  %v992_v55 = vmax.f32 %v936_v50, 0.0 }
 0x248   : > { %v1424_v52 = vpop.f32.mrf.mxu1 }
 0x249   : > { %v939_v53 = vadd.f32 %v1423_v51, %v2125_v34 }
 0x24a   : > { %v1425_v54 = vpop.f32.mrf.mxu1 }
 0x24b   : > { %v993_v56 = vmax.f32 %v939_v53, 0.0  ;;  %v1426_v57 = vadd.f32 %v1425_v54, %v1424_v52 }
 0x24c   : > { %v1427_v58 = vpop.f32.mrf.mxu1 }
 0x24d   : > { %v1007_v59 = vpack.c.bf16 %v993_v56, %v992_v55  ;;  %v944_v61 = vadd.f32 %v1426_v57, %v2125_v34 }
 0x24e   : > { %v1428_v60 = vpop.f32.mrf.mxu1 }
 0x24f   : > { %v1429_v62 = vadd.f32 %v1428_v60, %v1427_v58  ;;  %1493 = vmatmul.mubr.bf16.vlgmr.msra.gmra.mxu1 %v1007_v59  ;;  %v994_v2 = vmax.f32 %v944_v61, 0.0  ;;  %v1379_v59 = vld [vmem:[%s2221_s6] ss:$0 sm:$0xff] }
 0x250   : > { %v1430_v63 = vpop.f32.mrf.mxu1 }
 0x251   : > { %v947_v0 = vadd.f32 %v1429_v62, %v2125_v34 }
 0x252   : > { %v1431_v1 = vpop.f32.mrf.mxu1 }
 0x253   : > { %v995_v3 = vmax.f32 %v947_v0, 0.0  ;;  %v1432_v4 = vadd.f32 %v1431_v1, %v1430_v63 }
 0x254   : > { %v1433_v5 = vpop.f32.mrf.mxu1 }
 0x255   : > { %v1008_v6 = vpack.c.bf16 %v995_v3, %v994_v2  ;;  %v952_v8 = vadd.f32 %v1432_v4, %v2125_v34 }
 0x256   : > { %v1434_v7 = vpop.f32.mrf.mxu1 }
 0x257   : > { %v1435_v9 = vadd.f32 %v1434_v7, %v1433_v5  ;;  %1496 = vmatprep.mubr.bf16.mxu1 %v1008_v6  ;;  %v996_v13 = vmax.f32 %v952_v8, 0.0 }
 0x258   : > { %v1436_v10 = vpop.f32.mrf.mxu1 }
 0x259   : > { %v955_v11 = vadd.f32 %v1435_v9, %v2125_v34 }
 0x25a   : > { %v1437_v12 = vpop.f32.mrf.mxu1 }
 0x25b   : > { %v997_v14 = vmax.f32 %v955_v11, 0.0  ;;  %v1438_v15 = vadd.f32 %v1437_v12, %v1436_v10 }
 0x25c   : > { %v1439_v16 = vpop.f32.mrf.mxu1 }
 0x25d   : > { %v1009_v17 = vpack.c.bf16 %v997_v14, %v996_v13  ;;  %v960_v19 = vadd.f32 %v1438_v15, %v2125_v34 }
 0x25e   : > { %v1440_v18 = vpop.f32.mrf.mxu1 }
 0x25f   : > { %v1441_v20 = vadd.f32 %v1440_v18, %v1439_v16  ;;  %1497 = vmatmul.mubr.bf16.gmra.mxu1 %v1009_v17  ;;  %v998_v24 = vmax.f32 %v960_v19, 0.0 }
 0x260   : > { %v1442_v21 = vpop.f32.mrf.mxu1 }
 0x261   : > { %v963_v22 = vadd.f32 %v1441_v20, %v2125_v34 }
 0x262   : > { %v1443_v23 = vpop.f32.mrf.mxu1 }
 0x263   : > { %v999_v25 = vmax.f32 %v963_v22, 0.0  ;;  %v1444_v26 = vadd.f32 %v1443_v23, %v1442_v21 }
 0x264   : > { %v1445_v27 = vpop.f32.mrf.mxu1 }
 0x265   : > { %v1010_v28 = vpack.c.bf16 %v999_v25, %v998_v24  ;;  %v968_v30 = vadd.f32 %v1444_v26, %v2125_v34 }
 0x266   : > { %v1446_v29 = vpop.f32.mrf.mxu1 }
 0x267   : > { %v1447_v40 = vadd.f32 %v1446_v29, %v1445_v27  ;;  %1500 = vmatprep.mubr.bf16.mxu1 %v1010_v28  ;;  %v1000_v33 = vmax.f32 %v968_v30, 0.0 }
 0x268   : > { %v1448_v39 = vpop.f32.mrf.mxu1 }
 0x269   : > { %v971_v31 = vadd.f32 %v1447_v40, %v2125_v34 }
 0x26a   : > { %v1449_v32 = vpop.f32.mrf.mxu1 }
 0x26b   : > { %v1001_v35 = vmax.f32 %v971_v31, 0.0  ;;  %v1450_v36 = vadd.f32 %v1449_v32, %v1448_v39 }
 0x26c   : > { %v1451_v37 = vpop.f32.mrf.mxu1 }
 0x26d   : > { %v1011_v38 = vpack.c.bf16 %v1001_v35, %v1000_v33  ;;  %v976_v42 = vadd.f32 %v1450_v36, %v2125_v34 }
 0x26e   : > { %v1452_v41 = vpop.f32.mrf.mxu1 }
 0x26f   : > { %v1453_v43 = vadd.f32 %v1452_v41, %v1451_v37  ;;  %1501 = vmatmul.mubr.bf16.gmra.mxu1 %v1011_v38  ;;  %v1002_v47 = vmax.f32 %v976_v42, 0.0 }
 0x270   : > { %v1454_v44 = vpop.f32.mrf.mxu1 }
 0x271   : > { %v979_v45 = vadd.f32 %v1453_v43, %v2125_v34 }
 0x272   : > { %v1455_v46 = vpop.f32.mrf.mxu1 }
 0x273   : > { %v1003_v48 = vmax.f32 %v979_v45, 0.0  ;;  %v1456_v49 = vadd.f32 %v1455_v46, %v1454_v44 }
 0x274   : > { %v1457_v50 = vpop.f32.mrf.mxu1 }
 0x275   : > { %v1012_v51 = vpack.c.bf16 %v1003_v48, %v1002_v47  ;;  %v984_v53 = vadd.f32 %v1456_v49, %v2125_v34 }
 0x276   : > { %v1458_v52 = vpop.f32.mrf.mxu1 }
 0x277   : > { %v1459_v54 = vadd.f32 %v1458_v52, %v1457_v50  ;;  %1504 = vmatprep.mubr.bf16.mxu1 %v1012_v51  ;;  %v1004_v56 = vmax.f32 %v984_v53, 0.0 }
 0x279   : > { %v987_v55 = vadd.f32 %v1459_v54, %v2125_v34 }
 0x27b   : > { %v1005_v57 = vmax.f32 %v987_v55, 0.0 }
 0x27d   : > { %v1013_v58 = vpack.c.bf16 %v1005_v57, %v1004_v56 }
 0x27f   : > { %1505 = vmatmul.mubr.bf16.gmra.mxu1 %v1013_v58 }
 0x30f   : > { %v1494_v60 = vpop.f32.mrf.mxu1 }
 0x310   : > { %v1128_v61 = vadd.f32 %v1494_v60, %v1379_v59 }
 0x311   : > { %v1119_v62 = vpop.f32.mrf.mxu1 }
 0x312   : > { %1184 = vst [vmem:[%s2147_s22 + $0x10] sm:$0xff] %v1128_v61  ;;  %v1120_v34 = vadd.f32 %v1379_v59, %v1119_v62 }
 0x313   : > { %v1495_v63 = vpop.f32.mrf.mxu1 }
 0x314   : > { %1182 = vst [vmem:[%s2147_s22] sm:$0xff] %v1120_v34  ;;  %v1131_v0 = vadd.f32 %v1495_v63, %v1379_v59 }
 0x315   : > { %v1122_v1 = vpop.f32.mrf.mxu1 }
 0x316   : > { %1185 = vst [vmem:[%s2147_s22 + $0x18] sm:$0xff] %v1131_v0  ;;  %v1123_v2 = vadd.f32 %v1379_v59, %v1122_v1 }
 0x318   : > { %1183 = vst [vmem:[%s2147_s22 + $0x8] sm:$0xff] %v1123_v2 }
 0x31f   : > { %v1498_v3 = vpop.f32.mrf.mxu1 }
 0x320   : > { %v1144_v4 = vadd.f32 %v1498_v3, %v1379_v59 }
 0x321   : > { %v1135_v5 = vpop.f32.mrf.mxu1 }
 0x322   : > { %1188 = vst [vmem:[%s2147_s22 + $0x30] sm:$0xff] %v1144_v4  ;;  %v1136_v6 = vadd.f32 %v1379_v59, %v1135_v5 }
 0x323   : > { %v1499_v7 = vpop.f32.mrf.mxu1 }
 0x324   : > { %1186 = vst [vmem:[%s2147_s22 + $0x20] sm:$0xff] %v1136_v6  ;;  %v1147_v8 = vadd.f32 %v1499_v7, %v1379_v59 }
 0x325   : > { %v1138_v9 = vpop.f32.mrf.mxu1 }
 0x326   : > { %1189 = vst [vmem:[%s2147_s22 + $0x38] sm:$0xff] %v1147_v8  ;;  %v1139_v10 = vadd.f32 %v1379_v59, %v1138_v9 }
 0x328   : > { %1187 = vst [vmem:[%s2147_s22 + $0x28] sm:$0xff] %v1139_v10 }
 0x32f   : > { %v1502_v11 = vpop.f32.mrf.mxu1 }
 0x330   : > { %v1160_v12 = vadd.f32 %v1502_v11, %v1379_v59 }
 0x331   : > { %v1151_v13 = vpop.f32.mrf.mxu1 }
 0x332   : > { %1192 = vst [vmem:[%s2147_s22 + $0x50] sm:$0xff] %v1160_v12  ;;  %v1152_v14 = vadd.f32 %v1379_v59, %v1151_v13 }
 0x333   : > { %v1503_v15 = vpop.f32.mrf.mxu1 }
 0x334   : > { %1190 = vst [vmem:[%s2147_s22 + $0x40] sm:$0xff] %v1152_v14  ;;  %v1163_v16 = vadd.f32 %v1503_v15, %v1379_v59 }
 0x335   : > { %v1154_v17 = vpop.f32.mrf.mxu1 }
 0x336   : > { %1193 = vst [vmem:[%s2147_s22 + $0x58] sm:$0xff] %v1163_v16  ;;  %v1155_v18 = vadd.f32 %v1379_v59, %v1154_v17 }
 0x338   : > { %1191 = vst [vmem:[%s2147_s22 + $0x48] sm:$0xff] %v1155_v18 }
 0x33f   : > { %v1506_v19 = vpop.f32.mrf.mxu1 }
 0x340   : > { %v1176_v20 = vadd.f32 %v1506_v19, %v1379_v59 }
 0x341   : > { %v1167_v21 = vpop.f32.mrf.mxu1 }
 0x342   : > { %1196 = vst [vmem:[%s2147_s22 + $0x70] sm:$0xff] %v1176_v20  ;;  %v1168_v22 = vadd.f32 %v1379_v59, %v1167_v21 }
 0x343   : > { %v1507_v23 = vpop.f32.mrf.mxu1 }
 0x344   : > { %1194 = vst [vmem:[%s2147_s22 + $0x60] sm:$0xff] %v1168_v22  ;;  %v1179_v24 = vadd.f32 %v1507_v23, %v1379_v59 }
 0x345   : > { %v1170_v25 = vpop.f32.mrf.mxu1 }
 0x346   : > { %1197 = vst [vmem:[%s2147_s22 + $0x78] sm:$0xff] %v1179_v24  ;;  %v1171_v26 = vadd.f32 %v1379_v59, %v1170_v25 }
 0x348   : > { %1195 = vst [vmem:[%s2147_s22 + $0x68] sm:$0xff] %v1171_v26 }
 0x349   : > { %1784 = shalt.err (!%p1781_p9)
}
 0x34a   : > { %s1785_s11 = scalar_lea.hbm %s2168_s10, 2048  ;;  %s1789_s20 = scalar_lea.hbm %s2222_s7, 4096 }
 0x34b   : > { %p1786_p7 = scmp.ne.s32.totalorder %s2168_s10, %s1785_s11  ;;  %p1790_p6 = scmp.lt.s32.totalorder %s2168_s10, %s2222_s7 }
 0x34c   : > { %p1791_p11 = scmp.lt.s32.totalorder %s1789_s20, %s1785_s11 }
 0x34d   : > { %p1787_p4 = pnand %p1786_p7, %p2242_p0 }
 0x34e   : > { %p1792_p13 = por %p1791_p11, %p1790_p6 }
 0x34f   : > { %p1788_p8 = pneg %p1787_p4 }
 0x351   : > { %p1793_p12 = pnand %p1792_p13, %p1788_p8 }
 0x353   : > { %1796 = shalt.err (!%p1793_p12)
}
 0x354   : > { %s1856_s23 = smov 128   ;;  %s1857_s1 = smov 8  }
 0x355   : > { %1522 = dma.vmem_to_hbm [thread:$0]  (%p2242_p0), %s2170_s17, 2048, %s2168_s10, %s1199_s15, %s1856_s23, %s1856_s23, %s1857_s1  }
 0x356 PF: > { %s1227_s28 = sand.u32 1, %s1831_s24   ;;  %p2243_p5 = scmp.ne.s32.totalorder %s2229_s8, 0 }
 0x357   : > { %p2244_p10 = scmp.ge.s32.totalorder %s1843_s27, 2  ;;  %s1228_s30 = scalar_lea.sflag [#allocation4], %s1227_s28 }
 0x359   : > { %p1539_p1 = pnand %p2244_p10, %p2243_p5 }
 0x35b   : > { %p1540_p2 = pneg %p1539_p1 }
 0x35d   : > { %1826 = dma.done.wait (%p1540_p2), %s1228_s30, 2048  }
 0x35e   : > { %1828 = vsyncadd (%p1540_p2), %s1228_s30, 4294965248  ;;  %p22_p3 = scmp.ge.s32.totalorder %s1970_s13, 4   ;;  %s2245_s24 = smov %s1835_s25 }
 0x35f   : > { %s2246_s25 = smov %s1839_s26  ;;  %s2247_s26 = smov %s1988_s12 }
 0x360   : > { %s2248_s27 = smov %s1970_s13  ;;  %24 = sbr.rel (!%p22_p3) target bundleno = 9 (0x9), region = 105 }
 0x365   :  { %1233 = vsyncpa [#allocation3], 1 }
 0x366   :  { %1235 = vsyncpa [#allocation3 + $0x1], 1 }
 0x367   :  { %1236 = vsyncpa [#allocation6], 1 }
 0x368   :  { %1237 = vsyncpa [#allocation9], 1 }
 0x369   :  { %1238 = vsyncpa [#allocation4], 1 }
 0x36a   :  { %1240 = vsyncpa [#allocation4 + $0x1], 1 }

</bundles_post_ra>
